<compile_context>
chip_gen: v5e
topology: v5e:2x2
jax: 0.10.0
libtpu: 0.0.40
codegen_flags: <defaults>
</compile_context>

<pallas_src>
import jax
import jax.numpy as jnp
from jax.experimental import pallas as pl
from jax.experimental.pallas import tpu as pltpu


class params:
    INPUT_DIM = 40
    H_SIZES = 40
    LATENT_DIM = 5


def _encoder_kernel_t(x_ref, w1_ref, b1_ref, w2_ref, b2_ref, o_ref):
    # layer_1: W1 @ xT + b1  -> (H, TILE_B); batch on the lane axis, f32 MXU accumulate.
    h = jnp.dot(w1_ref[...], x_ref[...], preferred_element_type=jnp.float32)
    h = h + b1_ref[...]                       # (H, 1) broadcast over lanes (batch)
    # activ_1: LeakyReLU (default negative_slope = 0.01)
    h = jnp.maximum(h, 0.01 * h)
    # layer_c: W2 @ h + b2 -> (L, TILE_B)
    z = jnp.dot(w2_ref[...], h, preferred_element_type=jnp.float32)
    z = z + b2_ref[...]                       # (L, 1) broadcast over lanes (batch)
    # activ_c: Tanh
    o_ref[...] = jnp.tanh(z).astype(o_ref.dtype)


def _round_up(n, m):
    return ((n + m - 1) // m) * m


def encoder_forward_t(x_t, w1, b1, w2, b2, *, tile_b=4096):
    """Lane-dense transposed forward.

    x_t: (INPUT_DIM, B) f32  -- batch on the lane axis.
    w1:  (H_SIZES, INPUT_DIM)    PyTorch nn.Linear native (out, in) layout.
    b1:  (H_SIZES, 1)
    w2:  (LATENT_DIM, H_SIZES)
    b2:  (LATENT_DIM, 1)
    Returns (LATENT_DIM, B) f32.
    """
    D, B = x_t.shape
    H = w1.shape[0]
    L = w2.shape[0]

    # Batch tile on the lane axis: multiple of 128, capped at tile_b.
    TILE_B = min(tile_b, _round_up(B, 128))
    # Keep >= 2 grid steps for megacore (v7x) sharding when the batch is large enough.
    if B > 256 and pl.cdiv(B, TILE_B) < 2:
        TILE_B = max(128, _round_up(pl.cdiv(B, 2), 128))
    grid = (pl.cdiv(B, TILE_B),)

    # x / out march along the batch (lane) axis; weights & biases are resident.
    x_spec = pl.BlockSpec((D, TILE_B), lambda i: (0, i))
    o_spec = pl.BlockSpec((L, TILE_B), lambda i: (0, i))
    w1_spec = pl.BlockSpec((H, D), lambda i: (0, 0))
    b1_spec = pl.BlockSpec((H, 1), lambda i: (0, 0))
    w2_spec = pl.BlockSpec((L, H), lambda i: (0, 0))
    b2_spec = pl.BlockSpec((L, 1), lambda i: (0, 0))

    cost = pl.CostEstimate(
        flops=2 * B * (D * H + H * L),
        transcendentals=B * L,
        bytes_accessed=(B * (D + L) + D * H + H + H * L + L) * 4,
    )

    return pl.pallas_call(
        _encoder_kernel_t,
        out_shape=jax.ShapeDtypeStruct((L, B), jnp.float32),
        grid=grid,
        in_specs=[x_spec, w1_spec, b1_spec, w2_spec, b2_spec],
        out_specs=o_spec,
        compiler_params=pltpu.CompilerParams(
            dimension_semantics=("parallel",),
        ),
        cost_estimate=cost,
    )(x_t, w1, b1, w2, b2)


def encoder_forward(x, w1, b1, w2, b2, *, tile_b=4096):
    """Convenience wrapper with PyTorch's (B, INPUT_DIM) -> (B, LATENT_DIM) interface."""
    out_t = encoder_forward_t(x.T, w1, b1, w2, b2, tile_b=tile_b)
    return out_t.T


def init_params(key):
    """Deterministic init mirroring nn.Linear's default U(-1/sqrt(fan_in), +1/sqrt(fan_in)).

    Weights kept in PyTorch's native (out, in) layout; biases as column vectors so they
    broadcast over the lane (batch) axis inside the kernel.
    """
    k1, k2, k3, k4 = jax.random.split(key, 4)
    bound1 = 1.0 / jnp.sqrt(params.INPUT_DIM)
    bound2 = 1.0 / jnp.sqrt(params.H_SIZES)
    w1 = jax.random.uniform(k1, (params.H_SIZES, params.INPUT_DIM),
                            minval=-bound1, maxval=bound1, dtype=jnp.float32)
    b1 = jax.random.uniform(k2, (params.H_SIZES, 1),
                            minval=-bound1, maxval=bound1, dtype=jnp.float32)
    w2 = jax.random.uniform(k3, (params.LATENT_DIM, params.H_SIZES),
                            minval=-bound2, maxval=bound2, dtype=jnp.float32)
    b2 = jax.random.uniform(k4, (params.LATENT_DIM, 1),
                            minval=-bound2, maxval=bound2, dtype=jnp.float32)
    return w1, b1, w2, b2


def reference_forward(x, w1, b1, w2, b2):
    """Pure-JAX reference on the standard (B, D) layout."""
    h = x @ w1.T + b1.reshape(1, -1)
    h = jnp.where(h > 0, h, 0.01 * h)
    z = h @ w2.T + b2.reshape(1, -1)
    return jnp.tanh(z)


if __name__ == "__main__":
    key = jax.random.PRNGKey(0)
    kx, kp = jax.random.split(key)
    w1, b1, w2, b2 = init_params(kp)

    # Small batch (matches the module's toy scale); single padded grid step.
    batch = 8
    x = jax.random.normal(kx, (batch, params.INPUT_DIM), dtype=jnp.float32)
    out = jax.block_until_ready(encoder_forward(x, w1, b1, w2, b2))
    ref = reference_forward(x, w1, b1, w2, b2)
    assert out.shape == (batch, params.LATENT_DIM)
    assert jnp.allclose(out, ref, atol=1e-5, rtol=1e-5)

    # Larger, non-multiple-of-tile batch: exercises multi-step pipelined grid +
    # remainder tile, using the lane-dense transposed entry point directly.
    batch2 = 2500
    x2 = jax.random.normal(kx, (batch2, params.INPUT_DIM), dtype=jnp.float32)
    out2_t = jax.block_until_ready(encoder_forward_t(x2.T, w1, b1, w2, b2))
    ref2 = reference_forward(x2, w1, b1, w2, b2)
    assert out2_t.shape == (params.LATENT_DIM, batch2)
    assert jnp.allclose(out2_t.T, ref2, atol=1e-5, rtol=1e-5)

    print("KERNEL_OK")
</pallas_src>

<mosaic_0001>
module attributes {stable_mosaic.version = 11 : i64} {
  func.func @_encoder_kernel_t(%arg0: i32, %arg1: memref<40x128xf32, #tpu.memory_space<vmem>>, %arg2: memref<40x40xf32, #tpu.memory_space<vmem>>, %arg3: memref<40x1xf32, #tpu.memory_space<vmem>>, %arg4: memref<5x40xf32, #tpu.memory_space<vmem>>, %arg5: memref<5x1xf32, #tpu.memory_space<vmem>>, %arg6: memref<5x128xf32, #tpu.memory_space<vmem>>) attributes {dimension_semantics = [#tpu.dimension_semantics<parallel>], iteration_bounds = array<i64: 1>, scalar_prefetch = 0 : i64, scratch_operands = 0 : i64, tpu.core_type = #tpu.core_type<tc>, window_params = [{transform_indices = @transform_0, window_bounds = array<i64: 40, 128>}, {pipeline_mode = #tpu.pipeline_mode<synchronous>, transform_indices = @transform_1, window_bounds = array<i64: 40, 40>}, {pipeline_mode = #tpu.pipeline_mode<synchronous>, transform_indices = @transform_2, window_bounds = array<i64: 40, 1>}, {pipeline_mode = #tpu.pipeline_mode<synchronous>, transform_indices = @transform_3, window_bounds = array<i64: 5, 40>}, {pipeline_mode = #tpu.pipeline_mode<synchronous>, transform_indices = @transform_4, window_bounds = array<i64: 5, 1>}, {transform_indices = @transform_5, window_bounds = array<i64: 5, 128>}]} {
    %c0 = arith.constant 0 : index
    %c0_0 = arith.constant 0 : index
    %0 = vector.load %arg2[%c0, %c0_0] : memref<40x40xf32, #tpu.memory_space<vmem>>, vector<40x40xf32>
    %c0_1 = arith.constant 0 : index
    %c0_2 = arith.constant 0 : index
    %1 = vector.load %arg1[%c0_1, %c0_2] : memref<40x128xf32, #tpu.memory_space<vmem>>, vector<40x128xf32>
    %cst = arith.constant dense<0.000000e+00> : vector<40x128xf32>
    %2 = tpu.matmul %0, %1, %cst {dimension_numbers = #tpu.dot_dimension_numbers<[1], [0], [0], [1], [0, 0, 1, 1], [], []>} : vector<40x40xf32>, vector<40x128xf32>, vector<40x128xf32> -> vector<40x128xf32>
    %c0_3 = arith.constant 0 : index
    %c0_4 = arith.constant 0 : index
    %3 = vector.load %arg3[%c0_3, %c0_4] : memref<40x1xf32, #tpu.memory_space<vmem>>, vector<40x1xf32>
    %4 = vector.broadcast %3 : vector<40x1xf32> to vector<40x128xf32>
    %5 = arith.addf %2, %4 : vector<40x128xf32>
    %cst_5 = arith.constant 0.00999999977 : f32
    %6 = vector.broadcast %cst_5 : f32 to vector<40x128xf32>
    %7 = arith.mulf %6, %5 : vector<40x128xf32>
    %8 = arith.maximumf %5, %7 : vector<40x128xf32>
    %c0_6 = arith.constant 0 : index
    %c0_7 = arith.constant 0 : index
    %9 = vector.load %arg4[%c0_6, %c0_7] : memref<5x40xf32, #tpu.memory_space<vmem>>, vector<5x40xf32>
    %cst_8 = arith.constant dense<0.000000e+00> : vector<5x128xf32>
    %10 = tpu.matmul %9, %8, %cst_8 {dimension_numbers = #tpu.dot_dimension_numbers<[1], [0], [0], [1], [0, 0, 1, 1], [], []>} : vector<5x40xf32>, vector<40x128xf32>, vector<5x128xf32> -> vector<5x128xf32>
    %c0_9 = arith.constant 0 : index
    %c0_10 = arith.constant 0 : index
    %11 = vector.load %arg5[%c0_9, %c0_10] : memref<5x1xf32, #tpu.memory_space<vmem>>, vector<5x1xf32>
    %12 = vector.broadcast %11 : vector<5x1xf32> to vector<5x128xf32>
    %13 = arith.addf %10, %12 : vector<5x128xf32>
    %14 = math.tanh %13 : vector<5x128xf32>
    %c0_11 = arith.constant 0 : index
    %c0_12 = arith.constant 0 : index
    %15 = vector.load %arg6[%c0_11, %c0_12] : memref<5x128xf32, #tpu.memory_space<vmem>>, vector<5x128xf32>
    tpu.vector_store %arg6[%c0_11, %c0_12], %14 {strides = array<i32>} : memref<5x128xf32, #tpu.memory_space<vmem>>, vector<5x128xf32>,
    return
  }
  func.func @transform_0(%arg0: i32) -> (i32, i32) {
    %c0_i32 = arith.constant 0 : i32
    %c0_i32_0 = arith.constant 0 : i32
    return %c0_i32, %arg0 : i32, i32
  }
  func.func @transform_1(%arg0: i32) -> (i32, i32) {
    %c0_i32 = arith.constant 0 : i32
    %c0_i32_0 = arith.constant 0 : i32
    %c0_i32_1 = arith.constant 0 : i32
    return %c0_i32, %c0_i32_0 : i32, i32
  }
  func.func @transform_2(%arg0: i32) -> (i32, i32) {
    %c0_i32 = arith.constant 0 : i32
    %c0_i32_0 = arith.constant 0 : i32
    %c0_i32_1 = arith.constant 0 : i32
    return %c0_i32, %c0_i32_0 : i32, i32
  }
  func.func @transform_3(%arg0: i32) -> (i32, i32) {
    %c0_i32 = arith.constant 0 : i32
    %c0_i32_0 = arith.constant 0 : i32
    %c0_i32_1 = arith.constant 0 : i32
    return %c0_i32, %c0_i32_0 : i32, i32
  }
  func.func @transform_4(%arg0: i32) -> (i32, i32) {
    %c0_i32 = arith.constant 0 : i32
    %c0_i32_0 = arith.constant 0 : i32
    %c0_i32_1 = arith.constant 0 : i32
    return %c0_i32, %c0_i32_0 : i32, i32
  }
  func.func @transform_5(%arg0: i32) -> (i32, i32) {
    %c0_i32 = arith.constant 0 : i32
    %c0_i32_0 = arith.constant 0 : i32
    return %c0_i32, %arg0 : i32, i32
  }
}

</mosaic_0001>

<bundles_post_ra>
// kernel: tpu_custom_call.1
= control target key start
LH: loop header
LB: loop body
LE: loop exit
PB: predicated region body
PF: predicated region fallthrough
CT: control target
= control target key end

     0   :  { %v216_v3 = vmov 0   ;;  %s308_s0 = inlined_call_operand.vmem [shape: f32[40,8], index: 0, kind: input, shape index: {}]   ;;  %s309_s1 = inlined_call_operand.vmem [shape: f32[40,40], index: 1, kind: input, shape index: {}]   ;;  %s310_s2 = inlined_call_operand.vmem [shape: f32[40,1], index: 2, kind: input, shape index: {}]   ;;  %s311_s3 = inlined_call_operand.vmem [shape: f32[5,40], index: 3, kind: input, shape index: {}]   ;;  %s312_s4 = inlined_call_operand.vmem [shape: f32[5,1], index: 4, kind: input, shape index: {}]   ;;  %s313_s5 = inlined_call_operand.hbm [shape: f32[5,8], index: 5, kind: output, shape index: {}]  }
   0x1   :  { %v30_v0 = vld [vmem:[%s308_s0 + $0x20] sm:$0xff]  ;;  %v29_v1 = vld [vmem:[%s308_s0 + $0x18] sm:$0xff]  ;;  %v28_v2 = vld [vmem:[%s308_s0 + $0x10] sm:$0xff]  ;;  %185 = vset.pattern.permute.xlu0 %v216_v3 }
   0x2   :  { %174 = vmatpush.msra.mxu3 %v30_v0  ;;  %88 = vmatpush.msra.mxu0 %v30_v0  ;;  %v35_v4 = vld [vmem:[%s310_s2 + $0x20] sm:$0xff]  ;;  %v27_v5 = vld [vmem:[%s308_s0 + $0x8] sm:$0xff]  ;;  %v33_v6 = vld [vmem:[%s310_s2 + $0x10] sm:$0xff] }
   0x3   :  { %173 = vmatpush.msra.mxu2 %v30_v0  ;;  %58 = vperm.xlu0 %185, %v35_v4  }
   0x4   :  { %176 = vmatpush.msra.mxu3 %v29_v1  ;;  %89 = vmatpush.msra.mxu0 %v29_v1 }
   0x5   :  { %175 = vmatpush.msra.mxu2 %v29_v1 }
   0x6   :  { %178 = vmatpush.msra.mxu3 %v28_v2  ;;  %90 = vmatpush.msra.mxu0 %v28_v2 }
   0x7   :  { %10 = vsyncpa [#allocation3], 0  ;;  %177 = vmatpush.msra.mxu2 %v28_v2  ;;  %v26_v7 = vld [vmem:[%s308_s0] sm:$0xff]  ;;  %186 = vset.pattern.permute.xlu1 %v216_v3  ;;  %v24_v8 = vld [vmem:[%s309_s1 + $0x18] sm:$0xff]  ;;  %vm61_vm0 = vcmask 326656   ;;  %s158_s27 = sshll.u32 %s313_s5, 4  ;;  %s159_s27 = int_to_ptr.hbm [resolvable:$true] %s158_s27 }
   0x8   :  { %180 = vmatpush.msra.mxu3 %v27_v5  ;;  %91 = vmatpush.msra.mxu0 %v27_v5  ;;  %v21_v9 = vld [vmem:[%s309_s1] sm:$0xff]  ;;  %v23_v10 = vld [vmem:[%s309_s1 + $0x10] sm:$0xff]  ;;  %v34_v11 = vld [vmem:[%s310_s2 + $0x18] sm:$0xff] }
   0x9   :  { %179 = vmatpush.msra.mxu2 %v27_v5  ;;  %48 = vperm.xlu1 %186, %v33_v6   ;;  %v31_v12 = vld [vmem:[%s310_s2] sm:$0xff]  ;;  %v32_v13 = vld [vmem:[%s310_s2 + $0x8] sm:$0xff] }
   0xa   :  { %182 = vmatpush.msra.mxu3 %v26_v7  ;;  %92 = vmatpush.msra.mxu0 %v26_v7  ;;  %v25_v14 = vld [vmem:[%s309_s1 + $0x20] sm:$0xff]  ;;  %v22_v15 = vld [vmem:[%s309_s1 + $0x8] sm:$0xff] }
   0xb   :  { %170 = vmatmul.msk.f32.vlgmr.msra.gmra.mxu3 %vm61_vm0, %v24_v8  ;;  %167 = vmatmul.msk.f32.vlgmr.msra.gmra.mxu0 %vm61_vm0, %v21_v9  ;;  %v120_v16 = vld [vmem:[%s312_s4] sm:$0x1f]  ;;  %s217_s4 = smov [#allocation2]  }
   0xc   :  { %181 = vmatpush.msra.mxu2 %v26_v7  ;;  %187 = vset.pattern.permute.xlu2 %v216_v3  ;;  %v119_v42 = vld [vmem:[%s311_s3] sm:$0x1f]  ;;  %s156_s24 = sshll.u32 %s217_s4, 4  ;;  %s157_s24 = int_to_ptr.vmem [resolvable:$true] %s156_s24 }
   0xd   :  { %169 = vmatmul.msk.f32.vlgmr.msra.gmra.mxu2 %vm61_vm0, %v23_v10  ;;  %53 = vperm.xlu0 %185, %v34_v11  }
   0xe   :  { %38 = vperm.xlu2 %187, %v31_v12  }
  0x11   :  { %43 = vperm.xlu1 %186, %v32_v13  }
  0x13   :  { %171 = vmatmul.msk.f32.gmra.mxu3 %vm61_vm0, %v25_v14  ;;  %168 = vmatmul.msk.f32.gmra.mxu0 %vm61_vm0, %v22_v15 }
  0x16   :  { %123 = vperm.xlu2 %187, %v120_v16  }
  0x68   :  { %v39_v29 = vpop.permute.xlu2 %38 }
  0x70   :  { %v124_v43 = vpop.permute.xlu2 %123 }
  0x75   :  { %v59_v17 = vpop.permute.xlu0 %58 }
  0x7b   :  { %v49_v18 = vpop.permute.xlu1 %48 }
  0x7f   :  { %v54_v21 = vpop.permute.xlu0 %53 }
  0x83   :  { %v44_v24 = vpop.permute.xlu1 %43 }
  0x88   :  { %v94_v19 = vpop.f32.mrf.mxu0 }
  0x89   :  { %v95_v33 = vadd.f32 %v94_v19, %v39_v29 }
  0x8b   :  { %v109_v38 = vmul.f32 0.01, %v95_v33 }
  0x8d   :  { %v114_v41 = vmax.f32 %v95_v33, %v109_v38 }
  0x8e   :  { %v103_v20 = vpop.f32.mrf.mxu3 }
  0x8f   :  { %v104_v23 = vadd.f32 %v103_v20, %v54_v21 }
  0x90   :  { %v100_v22 = vpop.f32.mrf.mxu2  ;;  %v97_v25 = vpop.f32.mrf.mxu0 }
  0x91   :  { %v101_v27 = vadd.f32 %v100_v22, %v49_v18  ;;  %v112_v30 = vmul.f32 0.01, %v104_v23  ;;  %v98_v31 = vadd.f32 %v97_v25, %v44_v24 }
  0x93   :  { %v111_v34 = vmul.f32 0.01, %v101_v27  ;;  %v110_v36 = vmul.f32 0.01, %v98_v31  ;;  %v117_v37 = vmax.f32 %v104_v23, %v112_v30 }
  0x95   :  { %v116_v39 = vmax.f32 %v101_v27, %v111_v34  ;;  %v115_v40 = vmax.f32 %v98_v31, %v110_v36 }
  0x96   :  { %v106_v26 = vpop.f32.mrf.mxu3 }
  0x97   :  { %v107_v28 = vadd.f32 %v106_v26, %v59_v17 }
  0x99   :  { %v113_v32 = vmul.f32 0.01, %v107_v28 }
  0x9b   :  { %v118_v35 = vmax.f32 %v107_v28, %v113_v32 }
  0x9d   :  { %140 = vmatpush.msra.mxu1 %v118_v35 }
  0x9f   :  { %141 = vmatpush.msra.mxu1 %v117_v37 }
  0xa1   :  { %142 = vmatpush.msra.mxu1 %v116_v39 }
  0xa3   :  { %143 = vmatpush.msra.mxu1 %v115_v40 }
  0xa5   :  { %144 = vmatpush.msra.mxu1 %v114_v41 }
  0xa6   :  { %172 = vmatmul.msk.f32.vlgmr.msra.gmra.mxu1 %vm61_vm0, %v119_v42 }
 0x123   :  { %v146_v44 = vpop.f32.mrf.mxu1 }
 0x124   :  { %v147_v45 = vadd.f32 %v146_v44, %v124_v43 }
 0x126   :  { %188 = vtanh.f32 %v147_v45 }
 0x12c   :  { %v189_v46 = vpop.eup %188 }
 0x12d   :  { %150 = vst [vmem:[#allocation2] sm:$0x1f] %v189_v46 }
 0x12e   :  { %161 = dma.vmem_to_hbm [thread:$0]  %s157_s24, 128, %s159_s27, [#allocation3]  }
 0x12f   :  { %214 = dma.done.wait [#allocation3], 128  }
 0x130   :  { %215 = vsyncadd [#allocation3], 4294967168 }
 0x131   :  { %166 = vsyncpa [#allocation3], 1 }

</bundles_post_ra>
